<compile_context>
chip_gen: v7x
topology: tpu7x:2x2x1
jax: 0.10.0
libtpu: 0.0.40
codegen_flags: <defaults>
</compile_context>

<pallas_src>
import functools

import jax
import jax.numpy as jnp
import numpy as np
from jax import lax
from jax.experimental import pallas as pl
from jax.experimental.pallas import tpu as pltpu

_EPS = 1e-5                       # nn.BatchNorm2d default eps
_TM = 512                         # M-tile (rows of the im2col matrix)
_LANE = 128
_VMEM_LIMIT = 48 * 1024 * 1024    # fits v7x's 64 MiB VMEM with headroom


def _round_up(x, m):
    return ((x + m - 1) // m) * m


# ----------------------------- Pallas kernels --------------------------------
def _matmul_stats_kernel(x_ref, w_ref, out_ref, stat_ref):
    """Pass 1: conv-as-matmul tile + per-tile BN partial statistics.

    x_ref:    (tm, K_pad)  bf16 im2col patches (zero rows for M padding)
    w_ref:    (K_pad, C_pad) bf16 flattened conv weights
    out_ref:  (tm, C_pad)  f32 raw conv output
    stat_ref: (8, C_pad)   f32; row 0 = column sums, row 1 = column sum-of-squares
    """
    acc = jnp.dot(x_ref[...], w_ref[...], preferred_element_type=jnp.float32)
    out_ref[...] = acc
    s = jnp.sum(acc, axis=0, keepdims=True)
    q = jnp.sum(acc * acc, axis=0, keepdims=True)
    row = lax.broadcasted_iota(jnp.int32, (8, acc.shape[1]), 0)
    stat_ref[...] = jnp.where(row == 0, s, jnp.where(row == 1, q, 0.0))


def _bn_act_kernel(*refs, has_residual, apply_relu):
    """Pass 2: y = x*scale + shift (+ res*rscale + rshift) (+ ReLU)."""
    if has_residual:
        x_ref, scale_ref, shift_ref, res_ref, rscale_ref, rshift_ref, o_ref = refs
    else:
        x_ref, scale_ref, shift_ref, o_ref = refs
    y = x_ref[...] * scale_ref[...] + shift_ref[...]
    if has_residual:
        y = y + res_ref[...].astype(jnp.float32) * rscale_ref[...] + rshift_ref[...]
    if apply_relu:
        y = jnp.maximum(y, 0.0)
    o_ref[...] = y.astype(o_ref.dtype)


# ----------------------------- kernel wrappers --------------------------------
def _conv_stats(patches, w_flat, c_pad, tm):
    """Tiled conv-as-matmul + global batch statistics.

    patches: (M, K) im2col rows, w_flat: (K, Cout).
    Returns raw conv output (M_pad, c_pad) f32, mean (c_pad,), var (c_pad,).
    Zero-padded M rows / K columns contribute nothing to the statistics.
    """
    m, k = patches.shape
    cout = w_flat.shape[1]
    k_pad = _round_up(k, _LANE)
    m_pad = _round_up(m, tm)
    num_tiles = m_pad // tm

    x = jnp.pad(patches, ((0, m_pad - m), (0, k_pad - k))).astype(jnp.bfloat16)
    w = jnp.pad(w_flat, ((0, k_pad - k), (0, c_pad - cout))).astype(jnp.bfloat16)

    raw, stats = pl.pallas_call(
        _matmul_stats_kernel,
        out_shape=(jax.ShapeDtypeStruct((m_pad, c_pad), jnp.float32),
                   jax.ShapeDtypeStruct((num_tiles * 8, c_pad), jnp.float32)),
        grid_spec=pltpu.PrefetchScalarGridSpec(
            num_scalar_prefetch=0,
            grid=(num_tiles,),
            in_specs=[pl.BlockSpec((tm, k_pad), lambda i: (i, 0)),
                      pl.BlockSpec((k_pad, c_pad), lambda i: (0, 0))],
            out_specs=[pl.BlockSpec((tm, c_pad), lambda i: (i, 0)),
                       pl.BlockSpec((8, c_pad), lambda i: (i, 0))]),
        compiler_params=pltpu.CompilerParams(
            dimension_semantics=("parallel",),
            vmem_limit_bytes=_VMEM_LIMIT),
    )(x, w)

    stats = stats.reshape(num_tiles, 8, c_pad)
    total = jnp.sum(stats[:, 0, :], axis=0)
    total_sq = jnp.sum(stats[:, 1, :], axis=0)
    mean = total / m
    var = total_sq / m - mean * mean
    return raw, mean, var


def _bn_act(raw, scale, shift, tm, residual=None, apply_relu=False,
            out_dtype=jnp.float32):
    """Tiled elementwise BN-affine (+ normalized residual) (+ ReLU)."""
    m_pad, c_pad = raw.shape
    num_tiles = m_pad // tm

    def _vec(v):
        return v.reshape(1, c_pad).astype(jnp.float32)

    args = [raw, _vec(scale), _vec(shift)]
    in_specs = [pl.BlockSpec((tm, c_pad), lambda i: (i, 0)),
                pl.BlockSpec((1, c_pad), lambda i: (0, 0)),
                pl.BlockSpec((1, c_pad), lambda i: (0, 0))]
    if residual is not None:
        res, rscale, rshift = residual
        args += [res, _vec(rscale), _vec(rshift)]
        in_specs += [pl.BlockSpec((tm, c_pad), lambda i: (i, 0)),
                     pl.BlockSpec((1, c_pad), lambda i: (0, 0)),
                     pl.BlockSpec((1, c_pad), lambda i: (0, 0))]

    kernel = functools.partial(_bn_act_kernel,
                               has_residual=residual is not None,
                               apply_relu=apply_relu)
    return pl.pallas_call(
        kernel,
        out_shape=jax.ShapeDtypeStruct((m_pad, c_pad), out_dtype),
        grid_spec=pltpu.PrefetchScalarGridSpec(
            num_scalar_prefetch=0,
            grid=(num_tiles,),
            in_specs=in_specs,
            out_specs=pl.BlockSpec((tm, c_pad), lambda i: (i, 0))),
        compiler_params=pltpu.CompilerParams(
            dimension_semantics=("parallel",),
            vmem_limit_bytes=_VMEM_LIMIT),
    )(*args)


# ------------------------------- JAX glue ------------------------------------
def _im2col(x_nhwc, ksize, stride, pad):
    """Extract conv patches. Returns (N*Ho*Wo, k*k*C) and output spatial dims."""
    # TODO(synk): replace with an in-kernel halo-tiled conv (9 shifted matmuls)
    # to eliminate the 9x patch materialization in HBM for large shapes.
    n, h, w, c = x_nhwc.shape
    xp = jnp.pad(x_nhwc, ((0, 0), (pad, pad), (pad, pad), (0, 0)))
    ho = (h + 2 * pad - ksize) // stride + 1
    wo = (w + 2 * pad - ksize) // stride + 1
    cols = []
    for i in range(ksize):
        for j in range(ksize):
            cols.append(xp[:, i:i + stride * ho:stride, j:j + stride * wo:stride, :])
    patches = jnp.concatenate(cols, axis=-1)  # (N, Ho, Wo, k*k*C), [kh, kw, C] order
    return patches.reshape(n * ho * wo, ksize * ksize * c), (n, ho, wo)


class BasicBlockPallas:
    """Pallas port of the PyTorch BasicBlock (expansion = 1)."""

    expansion = 1

    def __init__(self, in_planes, planes, stride=1, *, key):
        self.in_planes = in_planes
        self.planes = planes
        self.stride = stride
        self.has_shortcut = (stride != 1) or (in_planes != self.expansion * planes)

        ks = jax.random.split(key, 9)
        # Conv weights stored HWIO so flattening matches the im2col [kh,kw,Cin] order.
        self.w1 = 0.1 * jax.random.normal(ks[0], (3, 3, in_planes, planes), jnp.float32)
        self.w2 = 0.1 * jax.random.normal(ks[1], (3, 3, planes, planes), jnp.float32)
        self.g1 = 1.0 + 0.1 * jax.random.normal(ks[2], (planes,), jnp.float32)
        self.b1 = 0.1 * jax.random.normal(ks[3], (planes,), jnp.float32)
        self.g2 = 1.0 + 0.1 * jax.random.normal(ks[4], (planes,), jnp.float32)
        self.b2 = 0.1 * jax.random.normal(ks[5], (planes,), jnp.float32)
        if self.has_shortcut:
            self.ws = 0.1 * jax.random.normal(ks[6], (1, 1, in_planes, planes), jnp.float32)
            self.gs = 1.0 + 0.1 * jax.random.normal(ks[7], (planes,), jnp.float32)
            self.bs = 0.1 * jax.random.normal(ks[8], (planes,), jnp.float32)

    @staticmethod
    def _affine(gamma, beta, mean, var, c_pad):
        """Fold batch stats + learnable affine into per-channel scale/shift.
        gamma/beta are zero-padded, so padded channels produce exactly 0."""
        g = jnp.pad(gamma, (0, c_pad - gamma.shape[0]))
        b = jnp.pad(beta, (0, c_pad - beta.shape[0]))
        scale = g * lax.rsqrt(var + _EPS)
        shift = b - mean * scale
        return scale, shift

    def __call__(self, x_nchw):
        # TODO(synk): when stacking blocks keep activations NHWC end-to-end and
        # transpose only at model boundaries; per-call transpose kept because
        # the public API is NCHW.
        x = jnp.transpose(x_nchw, (0, 2, 3, 1)).astype(jnp.float32)   # NHWC
        n, h, w, cin = x.shape
        planes = self.planes
        c_pad = _round_up(planes, _LANE)
        x_bf16 = x.astype(jnp.bfloat16)

        # --- out1 = relu(bn1(conv1(x))) --------------------------------------
        p1, (n_, ho, wo) = _im2col(x_bf16, 3, self.stride, 1)
        m = n_ * ho * wo
        tm = min(_TM, _round_up(m, 8))
        m_pad = _round_up(m, tm)

        raw1, mean1, var1 = _conv_stats(p1, self.w1.reshape(9 * cin, planes), c_pad, tm)
        scale1, shift1 = self._affine(self.g1, self.b1, mean1, var1, c_pad)
        out1 = _bn_act(raw1, scale1, shift1, tm, apply_relu=True,
                       out_dtype=jnp.bfloat16)                  # (m_pad, c_pad)
        out1_nhwc = out1[:m].reshape(n_, ho, wo, c_pad)

        # --- shortcut(x) -------------------------------------------------------
        if self.has_shortcut:
            ps, _ = _im2col(x_bf16, 1, self.stride, 0)
            raws, means, vars_ = _conv_stats(ps, self.ws.reshape(cin, planes),
                                             c_pad, tm)
            rscale, rshift = self._affine(self.gs, self.bs, means, vars_, c_pad)
            res = raws                                          # raw 1x1 conv (f32)
        else:
            res = jnp.pad(x, ((0, 0), (0, 0), (0, 0), (0, c_pad - cin)))
            res = jnp.pad(res.reshape(m, c_pad), ((0, m_pad - m), (0, 0)))
            rscale = jnp.ones((c_pad,), jnp.float32)
            rshift = jnp.zeros((c_pad,), jnp.float32)

        # --- out = relu(bn2(conv2(out1)) + shortcut) ---------------------------
        p2, _ = _im2col(out1_nhwc, 3, 1, 1)
        w2p = jnp.pad(self.w2, ((0, 0), (0, 0), (0, c_pad - planes), (0, 0)))
        raw2, mean2, var2 = _conv_stats(p2, w2p.reshape(9 * c_pad, planes), c_pad, tm)
        scale2, shift2 = self._affine(self.g2, self.b2, mean2, var2, c_pad)
        out = _bn_act(raw2, scale2, shift2, tm,
                      residual=(res, rscale, rshift), apply_relu=True,
                      out_dtype=jnp.float32)

        out = out[:m, :planes].reshape(n_, ho, wo, planes)
        return jnp.transpose(out, (0, 3, 1, 2))                  # back to NCHW


# ----------------------- pure-JAX reference (for checking) -------------------
def _ref_block(block, x_nchw):
    def conv(x, w_hwio, stride, pad):
        return lax.conv_general_dilated(
            x, w_hwio, (stride, stride), [(pad, pad), (pad, pad)],
            dimension_numbers=("NCHW", "HWIO", "NCHW"))

    def bn(x, g, b):
        mean = jnp.mean(x, axis=(0, 2, 3), keepdims=True)
        var = jnp.mean(jnp.square(x - mean), axis=(0, 2, 3), keepdims=True)
        return (x - mean) * lax.rsqrt(var + _EPS) * g.reshape(1, -1, 1, 1) \
            + b.reshape(1, -1, 1, 1)

    out = jax.nn.relu(bn(conv(x_nchw, block.w1, block.stride, 1), block.g1, block.b1))
    out = bn(conv(out, block.w2, 1, 1), block.g2, block.b2)
    if block.has_shortcut:
        sc = bn(conv(x_nchw, block.ws, block.stride, 0), block.gs, block.bs)
    else:
        sc = x_nchw
    return jax.nn.relu(out + sc)


# TODO(synk): BatchNorm running-stats buffer updates (momentum) are a training
# side effect and are not reproduced; the normalization math uses exact
# train-mode batch statistics, matching a freshly-constructed module's forward.

if __name__ == "__main__":
    key = jax.random.PRNGKey(0)
    k_x1, k_p1, k_x2, k_p2 = jax.random.split(key, 4)

    # Case 1: downsampling block with projection shortcut (stride 2).
    N, C_IN, H, W = 2, 4, 16, 16
    PLANES, STRIDE = 8, 2
    x1 = jax.random.normal(k_x1, (N, C_IN, H, W), jnp.float32)
    blk1 = BasicBlockPallas(C_IN, PLANES, stride=STRIDE, key=k_p1)
    o1 = jax.block_until_ready(blk1(x1))
    r1 = jax.block_until_ready(_ref_block(blk1, x1))
    assert o1.shape == (N, PLANES, H // STRIDE, W // STRIDE), o1.shape
    # bf16 MXU operands -> looser tolerance than a pure-f32 comparison.
    assert np.allclose(np.asarray(o1), np.asarray(r1), rtol=5e-2, atol=5e-2), \
        float(np.max(np.abs(np.asarray(o1) - np.asarray(r1))))

    # Case 2: identity-shortcut block (stride 1, Cin == planes), multi-tile M.
    N2, C2, H2, W2 = 4, 8, 16, 16
    x2 = jax.random.normal(k_x2, (N2, C2, H2, W2), jnp.float32)
    blk2 = BasicBlockPallas(C2, C2, stride=1, key=k_p2)
    o2 = jax.block_until_ready(blk2(x2))
    r2 = jax.block_until_ready(_ref_block(blk2, x2))
    assert o2.shape == (N2, C2, H2, W2), o2.shape
    assert np.allclose(np.asarray(o2), np.asarray(r2), rtol=5e-2, atol=5e-2), \
        float(np.max(np.abs(np.asarray(o2) - np.asarray(r2))))

    print("KERNEL_OK")
</pallas_src>

<mosaic_0001>
module attributes {stable_mosaic.version = 11 : i64} {
  func.func @_matmul_stats_kernel(%arg0: i32, %arg1: memref<128x128xbf16, #tpu.memory_space<vmem>>, %arg2: memref<128x128xbf16, #tpu.memory_space<vmem>>, %arg3: memref<128x128xf32, #tpu.memory_space<vmem>>, %arg4: memref<8x128xf32, #tpu.memory_space<vmem>>) attributes {dimension_semantics = [#tpu.dimension_semantics<parallel>], iteration_bounds = array<i64: 1>, scalar_prefetch = 0 : i64, scratch_operands = 0 : i64, tpu.core_type = #tpu.core_type<tc>, window_params = [{transform_indices = @transform_0, window_bounds = array<i64: 128, 128>}, {pipeline_mode = #tpu.pipeline_mode<synchronous>, transform_indices = @transform_1, window_bounds = array<i64: 128, 128>}, {transform_indices = @transform_2, window_bounds = array<i64: 128, 128>}, {transform_indices = @transform_3, window_bounds = array<i64: 8, 128>}]} {
    %c0 = arith.constant 0 : index
    %c0_0 = arith.constant 0 : index
    %0 = vector.load %arg1[%c0, %c0_0] : memref<128x128xbf16, #tpu.memory_space<vmem>>, vector<128x128xbf16>
    %c0_1 = arith.constant 0 : index
    %c0_2 = arith.constant 0 : index
    %1 = vector.load %arg2[%c0_1, %c0_2] : memref<128x128xbf16, #tpu.memory_space<vmem>>, vector<128x128xbf16>
    %cst = arith.constant dense<0.000000e+00> : vector<128x128xf32>
    %2 = tpu.matmul %0, %1, %cst {dimension_numbers = #tpu.dot_dimension_numbers<[1], [0], [0], [1], [0, 0, 1, 1], [], []>} : vector<128x128xbf16>, vector<128x128xbf16>, vector<128x128xf32> -> vector<128x128xf32>
    %c0_3 = arith.constant 0 : index
    %c0_4 = arith.constant 0 : index
    %3 = vector.load %arg3[%c0_3, %c0_4] : memref<128x128xf32, #tpu.memory_space<vmem>>, vector<128x128xf32>
    tpu.vector_store %arg3[%c0_3, %c0_4], %2 {strides = array<i32>} : memref<128x128xf32, #tpu.memory_space<vmem>>, vector<128x128xf32>,
    %cst_5 = arith.constant dense<0.000000e+00> : vector<128xf32>
    %4 = vector.multi_reduction <add>, %2, %cst_5 [0] : vector<128x128xf32> to vector<128xf32>
    %5 = vector.shape_cast %4 : vector<128xf32> to vector<1x128xf32>
    %6 = arith.mulf %2, %2 : vector<128x128xf32>
    %cst_6 = arith.constant dense<0.000000e+00> : vector<128xf32>
    %7 = vector.multi_reduction <add>, %6, %cst_6 [0] : vector<128x128xf32> to vector<128xf32>
    %8 = vector.shape_cast %7 : vector<128xf32> to vector<1x128xf32>
    %9 = tpu.iota {dimensions = array<i32: 0>} : vector<8x128xi32>
    %c0_i32 = arith.constant 0 : i32
    %10 = vector.broadcast %c0_i32 : i32 to vector<8x128xi32>
    %11 = arith.cmpi eq, %9, %10 : vector<8x128xi32>
    %c1_i32 = arith.constant 1 : i32
    %12 = vector.broadcast %c1_i32 : i32 to vector<8x128xi32>
    %13 = arith.cmpi eq, %9, %12 : vector<8x128xi32>
    %cst_7 = arith.constant 0.000000e+00 : f32
    %14 = vector.shape_cast %8 : vector<1x128xf32> to vector<1x128xf32>
    %15 = vector.broadcast %14 : vector<1x128xf32> to vector<8x128xf32>
    %16 = vector.broadcast %cst_7 : f32 to vector<8x128xf32>
    %17 = arith.select %13, %15, %16 : vector<8x128xi1>, vector<8x128xf32>
    %18 = vector.shape_cast %5 : vector<1x128xf32> to vector<1x128xf32>
    %19 = vector.broadcast %18 : vector<1x128xf32> to vector<8x128xf32>
    %20 = arith.select %11, %19, %17 : vector<8x128xi1>, vector<8x128xf32>
    %c0_8 = arith.constant 0 : index
    %c0_9 = arith.constant 0 : index
    %21 = vector.load %arg4[%c0_8, %c0_9] : memref<8x128xf32, #tpu.memory_space<vmem>>, vector<8x128xf32>
    tpu.vector_store %arg4[%c0_8, %c0_9], %20 {strides = array<i32>} : memref<8x128xf32, #tpu.memory_space<vmem>>, vector<8x128xf32>,
    return
  }
  func.func @transform_0(%arg0: i32) -> (i32, i32) {
    %c0_i32 = arith.constant 0 : i32
    %c0_i32_0 = arith.constant 0 : i32
    return %arg0, %c0_i32 : i32, i32
  }
  func.func @transform_1(%arg0: i32) -> (i32, i32) {
    %c0_i32 = arith.constant 0 : i32
    %c0_i32_0 = arith.constant 0 : i32
    %c0_i32_1 = arith.constant 0 : i32
    return %c0_i32, %c0_i32_0 : i32, i32
  }
  func.func @transform_2(%arg0: i32) -> (i32, i32) {
    %c0_i32 = arith.constant 0 : i32
    %c0_i32_0 = arith.constant 0 : i32
    return %arg0, %c0_i32 : i32, i32
  }
  func.func @transform_3(%arg0: i32) -> (i32, i32) {
    %c0_i32 = arith.constant 0 : i32
    %c0_i32_0 = arith.constant 0 : i32
    return %arg0, %c0_i32 : i32, i32
  }
}

</mosaic_0001>

<bundles_post_ra>
// kernel: tpu_custom_call.1
= control target key start
LH: loop header
LB: loop body
LE: loop exit
PB: predicated region body
PF: predicated region fallthrough
CT: control target
= control target key end

     0   :  { %9 = vsyncpa [#allocation3], 0  ;;  %s676_s0 = inlined_call_operand.hbm [shape: bf16[128,128], index: 0, kind: input, shape index: {}]   ;;  %s677_s1 = inlined_call_operand.hbm [shape: bf16[128,128], index: 1, kind: input, shape index: {}]   ;;  %s678_s2 = inlined_call_operand.hbm [shape: f32[128,128], index: 2, kind: output, shape index: {0}]   ;;  %s679_s3 = inlined_call_operand.hbm [shape: f32[8,128], index: 3, kind: output, shape index: {1}]  }
   0x1   :  { %10 = vsyncpa [#allocation6], 0 }
   0x2   :  { %11 = vsyncpa [#allocation4], 0 }
   0x3   :  { %12 = vsyncpa [#allocation9], 0  ;;  %s582_s12 = smov [#allocation2]   ;;  %s486_s16 = scalar_lea.hbm %s676_s0, 1024 }
   0x4   :  { %s18_s13 = sshll.u32 %s582_s12, 4  ;;  %p487_p0 = scmp.ne.s32.totalorder %s676_s0, %s486_s16  ;;  %s19_s13 = int_to_ptr.vmem [resolvable:$true] %s18_s13 }
   0x5   :  { %p490_p1 = scmp.lt.u32.totalorder %s486_s16, %s676_s0 }
   0x7   :  { %p492_p2 = pnand %p490_p1, %p487_p0 }
   0x9   :  { %495 = shalt.err (!%p492_p2)
}
   0xa   :  { %s496_s21 = scalar_lea.vmem %s19_s13, 1024  ;;  %p501_p4 = scmp.lt.s32.totalorder %s19_s13, %s19_s13 }
   0xb   :  { %p497_p3 = scmp.ne.s32.totalorder %s19_s13, %s496_s21  ;;  %p502_p5 = scmp.lt.s32.totalorder %s496_s21, %s496_s21 }
   0xd   :  { %p503_p6 = por %p502_p5, %p501_p4 }
   0xf   :  { %p504_p7 = pnand %p503_p6, %p497_p3 }
  0x11   :  { %507 = shalt.err (!%p504_p7)
}
  0x12   :  { %s583_s22 = smov 64   ;;  %s584_s23 = smov 4  }
  0x13   :  { %24 = dma.hbm_to_vmem [thread:$0]  %s676_s0, 1024, %s19_s13, [#allocation3], %s583_s22, %s583_s22, %s584_s23  }
  0x14   :  { %s585_s26 = smov [#allocation5]   ;;  %s508_s30 = scalar_lea.hbm %s677_s1, 1024 }
  0x15   :  { %s30_s27 = sshll.u32 %s585_s26, 4  ;;  %p509_p8 = scmp.ne.s32.totalorder %s677_s1, %s508_s30  ;;  %s31_s27 = int_to_ptr.vmem [resolvable:$true] %s30_s27 }
  0x16   :  { %p512_p9 = scmp.lt.u32.totalorder %s508_s30, %s677_s1 }
  0x18   :  { %p514_p10 = pnand %p512_p9, %p509_p8 }
  0x1a   :  { %517 = shalt.err (!%p514_p10)
}
  0x1b   :  { %s518_s8 = scalar_lea.vmem %s31_s27, 1024  ;;  %p523_p12 = scmp.lt.s32.totalorder %s31_s27, %s31_s27 }
  0x1c   :  { %p519_p11 = scmp.ne.s32.totalorder %s31_s27, %s518_s8  ;;  %p524_p13 = scmp.lt.s32.totalorder %s518_s8, %s518_s8 }
  0x1e   :  { %p525_p0 = por %p524_p13, %p523_p12 }
  0x20   :  { %p526_p1 = pnand %p525_p0, %p519_p11 }
  0x22   :  { %529 = shalt.err (!%p526_p1)
}
  0x23   :  { %36 = dma.hbm_to_vmem [thread:$0]  %s677_s1, 1024, %s31_s27, [#allocation6], %s583_s22, %s583_s22, %s584_s23  }
  0x24   :  { %574 = dma.done.wait [#allocation3], 1024  }
  0x25   :  { %575 = vsyncadd [#allocation3], 4294966272 }
  0x26   :  { %576 = dma.done.wait [#allocation6], 1024  }
  0x27   :  { %577 = vsyncadd [#allocation6], 4294966272  ;;  %v470_v0 = vld [vmem:[#allocation5] sm:$0xff]   ;;  %v471_v1 = vld [vmem:[#allocation5 + $0x8] sm:$0xff]   ;;  %s586_s1 = smov [#allocation7]  }
  0x28   :  { %414 = vmatprep.subr.bf16.mxu0 %v470_v0  ;;  %446 = vmatprep.subr.bf16.mxu1 %v470_v0  ;;  %v472_v2 = vld [vmem:[#allocation5 + $0x10] sm:$0xff]   ;;  %v473_v3 = vld [vmem:[#allocation5 + $0x18] sm:$0xff]   ;;  %v478_v4 = vld [vmem:[#allocation2] sm:$0xff]   ;;  %s355_s10 = sshll.u32 %s586_s1, 4  ;;  %s356_s10 = int_to_ptr.vmem [resolvable:$true] %s355_s10 }
  0x29   :  { %415 = vmatpush3.bf16.msra.mxu0 %v470_v0  ;;  %454 = vmatpush3.bf16.msra.mxu1 %v470_v0  ;;  %v474_v5 = vld [vmem:[#allocation5 + $0x20] sm:$0xff]   ;;  %v475_v7 = vld [vmem:[#allocation5 + $0x28] sm:$0xff]   ;;  %v476_v8 = vld [vmem:[#allocation5 + $0x30] sm:$0xff]   ;;  %s530_s11 = scalar_lea.vmem %s356_s10, 2048  ;;  %p535_p3 = scmp.lt.s32.totalorder %s356_s10, %s356_s10 }
  0x2a   :  { %416 = vmatprep.subr.bf16.mxu0 %v471_v1  ;;  %447 = vmatprep.subr.bf16.mxu1 %v471_v1  ;;  %v482_v6 = vld [vmem:[#allocation2 + $0x20] sm:$0xff]   ;;  %v477_v9 = vld [vmem:[#allocation5 + $0x38] sm:$0xff]   ;;  %v479_v10 = vld [vmem:[#allocation2 + $0x8] sm:$0xff]   ;;  %p531_p2 = scmp.ne.s32.totalorder %s356_s10, %s530_s11  ;;  %p536_p4 = scmp.lt.s32.totalorder %s530_s11, %s530_s11 }
  0x2b   :  { %430 = vmatprep.mubr.bf16.mxu0 %v478_v4  ;;  %438 = vmatprep.mubr.bf16.mxu1 %v482_v6  ;;  %v483_v11 = vld [vmem:[#allocation2 + $0x28] sm:$0xff]   ;;  %v480_v12 = vld [vmem:[#allocation2 + $0x10] sm:$0xff]   ;;  %v481_v14 = vld [vmem:[#allocation2 + $0x18] sm:$0xff]  }
  0x2c   :  { %v484_v13 = vld [vmem:[#allocation2 + $0x30] sm:$0xff]   ;;  %v485_v15 = vld [vmem:[#allocation2 + $0x38] sm:$0xff]   ;;  %p537_p5 = por %p536_p4, %p535_p3 }
  0x2d   :  { %417 = vmatpush3.bf16.msra.mxu0 %v471_v1  ;;  %455 = vmatpush3.bf16.msra.mxu1 %v471_v1 }
  0x2e   :  { %418 = vmatprep.subr.bf16.mxu0 %v472_v2  ;;  %448 = vmatprep.subr.bf16.mxu1 %v472_v2  ;;  %p538_p6 = pnand %p537_p5, %p531_p2 }
  0x31   :  { %419 = vmatpush3.bf16.msra.mxu0 %v472_v2  ;;  %456 = vmatpush3.bf16.msra.mxu1 %v472_v2 }
  0x32   :  { %420 = vmatprep.subr.bf16.mxu0 %v473_v3  ;;  %449 = vmatprep.subr.bf16.mxu1 %v473_v3 }
  0x35   :  { %421 = vmatpush3.bf16.msra.mxu0 %v473_v3  ;;  %457 = vmatpush3.bf16.msra.mxu1 %v473_v3 }
  0x36   :  { %422 = vmatprep.subr.bf16.mxu0 %v474_v5  ;;  %450 = vmatprep.subr.bf16.mxu1 %v474_v5 }
  0x39   :  { %423 = vmatpush3.bf16.msra.mxu0 %v474_v5  ;;  %458 = vmatpush3.bf16.msra.mxu1 %v474_v5 }
  0x3a   :  { %424 = vmatprep.subr.bf16.mxu0 %v475_v7  ;;  %451 = vmatprep.subr.bf16.mxu1 %v475_v7 }
  0x3d   :  { %425 = vmatpush3.bf16.msra.mxu0 %v475_v7  ;;  %459 = vmatpush3.bf16.msra.mxu1 %v475_v7 }
  0x3e   :  { %426 = vmatprep.subr.bf16.mxu0 %v476_v8  ;;  %452 = vmatprep.subr.bf16.mxu1 %v476_v8 }
  0x41   :  { %427 = vmatpush3.bf16.msra.mxu0 %v476_v8  ;;  %460 = vmatpush3.bf16.msra.mxu1 %v476_v8 }
  0x42   :  { %428 = vmatprep.subr.bf16.mxu0 %v477_v9  ;;  %453 = vmatprep.subr.bf16.mxu1 %v477_v9 }
  0x45   :  { %429 = vmatpush3.bf16.msra.mxu0 %v477_v9  ;;  %461 = vmatpush3.bf16.msra.mxu1 %v477_v9 }
  0x48   :  { %431 = vmatmul.mubr.bf16.vlgmr.msra.gmra.mrb[0].mxu0 %v479_v10  ;;  %439 = vmatmul.mubr.bf16.vlgmr.msra.gmra.mrb[0].mxu1 %v483_v11 }
  0x49   :  { %434 = vmatprep.mubr.bf16.mxu0 %v480_v12  ;;  %442 = vmatprep.mubr.bf16.mxu1 %v484_v13 }
  0x50   :  { %435 = vmatmul.mubr.bf16.gmra.mrb[4].mxu0 %v481_v14  ;;  %443 = vmatmul.mubr.bf16.gmra.mrb[4].mxu1 %v485_v15 }
 0x11b   :  { %v432_v16 = vpop.f32.mrb[0].mxu0  ;;  %v634_v17 = vpop.f32.mrb[0].mxu1 }
 0x11c   :  { %271 = vst [vmem:[#allocation7 + $0x10] sm:$0xff] %v432_v16  ;;  %v206_v18 = vpop.f32.mrb[1].mxu0  ;;  %279 = vst [vmem:[#allocation7 + $0x50] sm:$0xff] %v634_v17  ;;  %v637_v19 = vpop.f32.mrb[1].mxu1  ;;  %v308_v27 = vmul.f32 %v432_v16, %v432_v16 }
 0x11d   :  { %269 = vst [vmem:[#allocation7] sm:$0xff] %v206_v18  ;;  %v433_v20 = vpop.f32.mrb[2].mxu0  ;;  %277 = vst [vmem:[#allocation7 + $0x40] sm:$0xff] %v637_v19  ;;  %v640_v21 = vpop.f32.mrb[2].mxu1  ;;  %v306_v24 = vmul.f32 %v206_v18, %v206_v18 }
 0x11e   :  { %272 = vst [vmem:[#allocation7 + $0x18] sm:$0xff] %v433_v20  ;;  %v209_v22 = vpop.f32.mrb[3].mxu0  ;;  %280 = vst [vmem:[#allocation7 + $0x58] sm:$0xff] %v640_v21  ;;  %v241_v23 = vpop.f32.mrb[3].mxu1  ;;  %v309_v30 = vmul.f32 %v433_v20, %v433_v20 }
 0x11f   :  { %270 = vst [vmem:[#allocation7 + $0x8] sm:$0xff] %v209_v22  ;;  %v285_v25 = vadd.f32 %v209_v22, %v206_v18  ;;  %v307_v26 = vmul.f32 %v209_v22, %v209_v22  ;;  %278 = vst [vmem:[#allocation7 + $0x48] sm:$0xff] %v241_v23 }
 0x121   :  { %v286_v28 = vadd.f32 %v432_v16, %v285_v25  ;;  %v322_v29 = vadd.f32 %v307_v26, %v306_v24 }
 0x123   :  { %v323_v31 = vadd.f32 %v322_v29, %v308_v27  ;;  %v436_v32 = vpop.f32.mrb[4].mxu0  ;;  %v287_v33 = vadd.f32 %v433_v20, %v286_v28  ;;  %v444_v34 = vpop.f32.mrb[4].mxu1 }
 0x124   :  { %275 = vst [vmem:[#allocation7 + $0x30] sm:$0xff] %v436_v32  ;;  %v222_v35 = vpop.f32.mrb[5].mxu0  ;;  %283 = vst [vmem:[#allocation7 + $0x70] sm:$0xff] %v444_v34  ;;  %v254_v36 = vpop.f32.mrb[5].mxu1 }
 0x125   :  { %273 = vst [vmem:[#allocation7 + $0x20] sm:$0xff] %v222_v35  ;;  %v288_v37 = vadd.f32 %v287_v33, %v222_v35  ;;  %v310_v38 = vmul.f32 %v222_v35, %v222_v35  ;;  %v324_v39 = vadd.f32 %v323_v31, %v309_v30  ;;  %v437_v40 = vpop.f32.mrb[6].mxu0  ;;  %281 = vst [vmem:[#allocation7 + $0x60] sm:$0xff] %v254_v36  ;;  %v445_v41 = vpop.f32.mrb[6].mxu1 }
 0x126   :  { %276 = vst [vmem:[#allocation7 + $0x38] sm:$0xff] %v437_v40  ;;  %v225_v42 = vpop.f32.mrb[7].mxu0  ;;  %284 = vst [vmem:[#allocation7 + $0x78] sm:$0xff] %v445_v41  ;;  %v257_v43 = vpop.f32.mrb[7].mxu1 }
 0x127   :  { %v325_v44 = vadd.f32 %v324_v39, %v310_v38  ;;  %274 = vst [vmem:[#allocation7 + $0x28] sm:$0xff] %v225_v42  ;;  %v289_v45 = vadd.f32 %v288_v37, %v225_v42  ;;  %v311_v46 = vmul.f32 %v225_v42, %v225_v42  ;;  %282 = vst [vmem:[#allocation7 + $0x68] sm:$0xff] %v257_v43 }
 0x128   :  { %541 = shalt.err (!%p538_p6)
}
 0x129   :  { %s542_s14 = scalar_lea.hbm %s678_s2, 2048 }
 0x12a   :  { %p543_p7 = scmp.ne.s32.totalorder %s678_s2, %s542_s14  ;;  %p546_p8 = scmp.lt.u32.totalorder %s542_s14, %s678_s2 }
 0x12c   :  { %p548_p9 = pnand %p546_p8, %p543_p7 }
 0x12e   :  { %551 = shalt.err (!%p548_p9)
}
 0x12f   :  { %s587_s19 = smov 128   ;;  %s588_s20 = smov 8   ;;  %v312_v47 = vmul.f32 %v436_v32, %v436_v32  ;;  %v290_v48 = vadd.f32 %v436_v32, %v289_v45  ;;  %v326_v49 = vadd.f32 %v325_v44, %v311_v46  ;;  %v313_v50 = vmul.f32 %v437_v40, %v437_v40 }
 0x130   :  { %361 = dma.vmem_to_hbm [thread:$0]  %s356_s10, 2048, %s678_s2, [#allocation4], %s587_s19, %s587_s19, %s588_s20   ;;  %v314_v53 = vmul.f32 %v637_v19, %v637_v19  ;;  %v315_v58 = vmul.f32 %v241_v23, %v241_v23  ;;  %v316_v59 = vmul.f32 %v634_v17, %v634_v17  ;;  %v317_v62 = vmul.f32 %v640_v21, %v640_v21 }
 0x131   :  { %v327_v51 = vadd.f32 %v326_v49, %v312_v47  ;;  %v291_v52 = vadd.f32 %v437_v40, %v290_v48  ;;  %v318_v1 = vmul.f32 %v254_v36, %v254_v36  ;;  %v319_v6 = vmul.f32 %v257_v43, %v257_v43  ;;  %s589_s2 = smov [#allocation8]  }
 0x132   :  { %v320_v7 = vmul.f32 %v444_v34, %v444_v34  ;;  %v321_v10 = vmul.f32 %v445_v41, %v445_v41  ;;  %s368_s23 = sshll.u32 %s589_s2, 4  ;;  %s369_s23 = int_to_ptr.vmem [resolvable:$true] %s368_s23 }
 0x133   :  { %v292_v54 = vadd.f32 %v291_v52, %v637_v19  ;;  %v328_v55 = vadd.f32 %v327_v51, %v313_v50  ;;  %s552_s24 = scalar_lea.vmem %s369_s23, 128  ;;  %p557_p11 = scmp.lt.s32.totalorder %s369_s23, %s369_s23 }
 0x134   :  { %p553_p10 = scmp.ne.s32.totalorder %s369_s23, %s552_s24  ;;  %p558_p12 = scmp.lt.s32.totalorder %s552_s24, %s552_s24 }
 0x135   :  { %v329_v56 = vadd.f32 %v328_v55, %v314_v53  ;;  %v293_v57 = vadd.f32 %v292_v54, %v241_v23 }
 0x136   :  { %p559_p13 = por %p558_p12, %p557_p11 }
 0x137   :  { %v294_v60 = vadd.f32 %v634_v17, %v293_v57  ;;  %v330_v61 = vadd.f32 %v329_v56, %v315_v58  ;;  %v343_v17 = vlaneseq }
 0x138   :  { %p560_p0 = pnand %p559_p13, %p553_p10 }
 0x139   :  { %v331_v63 = vadd.f32 %v330_v61, %v316_v59  ;;  %v295_v0 = vadd.f32 %v640_v21, %v294_v60  ;;  %v344_v22 = vshrl.u32 %v343_v17, 7 }
 0x13b   :  { %v296_v2 = vadd.f32 %v295_v0, %v254_v36  ;;  %v332_v3 = vadd.f32 %v331_v63, %v317_v62  ;;  %vm346_vm0 = vcmp.eq.s32.totalorder %v344_v22, 1  ;;  %vm345_vm1 = vcmp.eq.s32.totalorder %v344_v22, 0 }
 0x13d   :  { %v333_v4 = vadd.f32 %v332_v3, %v318_v1  ;;  %v297_v5 = vadd.f32 %v296_v2, %v257_v43 }
 0x13f   :  { %v298_v8 = vadd.f32 %v444_v34, %v297_v5  ;;  %v334_v9 = vadd.f32 %v333_v4, %v319_v6 }
 0x141   :  { %v299_v11 = vadd.f32 %v445_v41, %v298_v8  ;;  %v335_v12 = vadd.f32 %v334_v9, %v320_v7 }
 0x143   :  { %v300_v13 = vrot.slane %v299_v11, 4  ;;  %v336_v14 = vadd.f32 %v335_v12, %v321_v10 }
 0x145   :  { %v301_v15 = vadd.f32 %v300_v13, %v299_v11  ;;  %v337_v16 = vrot.slane %v336_v14, 4 }
 0x147   :  { %v302_v18 = vrot.slane %v301_v15, 2  ;;  %v338_v19 = vadd.f32 %v337_v16, %v336_v14 }
 0x149   :  { %v303_v20 = vadd.f32 %v302_v18, %v301_v15  ;;  %v339_v21 = vrot.slane %v338_v19, 2 }
 0x14b   :  { %v340_v23 = vadd.f32 %v339_v21, %v338_v19  ;;  %v304_v24 = vrot.slane %v303_v20, 1 }
 0x14d   :  { %v341_v25 = vrot.slane %v340_v23, 1  ;;  %v305_v27 = vadd.f32 %v304_v24, %v303_v20 }
 0x14f   :  { %v342_v26 = vadd.f32 %v341_v25, %v340_v23 }
 0x151   :  { %v347_v28 = vsel %vm346_vm0, %v342_v26, 0.0 }
 0x152   :  { %v348_v29 = vsel %vm345_vm1, %v305_v27, %v347_v28 }
 0x153   :  { %349 = vst [vmem:[#allocation8] sm:$0xff] %v348_v29 }
 0x154   :  { %563 = shalt.err (!%p560_p0)
}
 0x155   :  { %s564_s27 = scalar_lea.hbm %s679_s3, 128 }
 0x156   :  { %p565_p1 = scmp.ne.s32.totalorder %s679_s3, %s564_s27  ;;  %p568_p2 = scmp.lt.u32.totalorder %s564_s27, %s679_s3 }
 0x158   :  { %p570_p3 = pnand %p568_p2, %p565_p1 }
 0x15a   :  { %573 = shalt.err (!%p570_p3)
}
 0x15b   :  { %371 = dma.vmem_to_hbm [thread:$0]  %s369_s23, 128, %s679_s3, [#allocation9]  }
 0x15c   :  { %578 = dma.done.wait [#allocation4], 2048  }
 0x15d   :  { %579 = vsyncadd [#allocation4], 4294965248 }
 0x15e   :  { %580 = dma.done.wait [#allocation9], 128  }
 0x15f   :  { %581 = vsyncadd [#allocation9], 4294967168 }
 0x160   :  { %378 = vsyncpa [#allocation3], 1 }
 0x161   :  { %379 = vsyncpa [#allocation6], 1 }
 0x162   :  { %380 = vsyncpa [#allocation4], 1 }
 0x163   :  { %381 = vsyncpa [#allocation9], 1 }

</bundles_post_ra>
